<compile_context>
chip_gen: v7x
topology: tpu7x:2x2x1
jax: 0.10.0
libtpu: 0.0.40
codegen_flags: <defaults>
</compile_context>

<pallas_src>
import jax
import jax.numpy as jnp
import numpy as np
from jax.experimental import pallas as pl
from jax.experimental.pallas import tpu as pltpu

# ---------------- problem sizes (small, consistent with the module) --------
BACKBONE = "alexnet"
OUT_CHANNEL = {"alexnet": 256}          # subset of the module's table
C = OUT_CHANNEL[BACKBONE]               # feature dim (out_channel[backbone])
DIM = 128                               # hidden dim of attention / classifier
NUM_CLASSES = 4
B = 2                                   # batch (number of bags)
K = 8                                   # number of patches per bag
PAD_N = 128                             # lane-dense padding for the logits


# ---------------- Pallas kernel --------------------------------------------
def varmil_kernel(x_ref, w1_ref, b1_ref, w2_ref, b2_ref,
                  w3m_ref, w3v_ref, b3_ref, w4_ref, b4_ref,
                  a_out_ref, out_ref):
    x = x_ref[...]                                           # (B, K, C)

    # ---- attention MLP layer 1: one MXU pass over all B*K patch rows ----
    xf = x.reshape(B * K, C)                                 # layout-preserving
    h = jnp.tanh(
        jnp.dot(xf, w1_ref[...], preferred_element_type=jnp.float32)
        + b1_ref[...]
    ).reshape(B, K, DIM)                                     # (B, K, DIM)

    # ---- attention layer 2: VPU multiply + lane reduction (no N=1 matmul) --
    logits = jnp.sum(h * w2_ref[...], axis=2, keepdims=True) + b2_ref[0]  # (B,K,1)

    # ---- mask all-zero patches ----
    empty = jnp.all(x == 0.0, axis=2, keepdims=True)         # (B, K, 1) bool
    logits = jnp.where(empty, jnp.float32(-9e15), logits)

    # ---- batched per-bag softmax (reductions over the K sublane axis) ----
    a_max = jnp.max(logits, axis=1, keepdims=True)           # (B, 1, 1)
    e = jnp.exp(logits - a_max)                              # (B, K, 1)
    denom = jnp.sum(e, axis=1, keepdims=True)                # (B, 1, 1)
    attn = e * pl.reciprocal(denom, approx=False)            # (B, K, 1)

    # ---- weighted mean / weighted variance, batched over B ----
    M = jnp.sum(attn * x, axis=1)                            # (B, C)
    S = (x - M[:, None, :]) ** 2                             # (B, K, C)
    V = jnp.sum(attn * S, axis=1)                            # (B, C)

    # nb_patch correction n/(n-1): n==1 -> 1 (posinf clamp in the reference),
    # n==0 -> 0/(-1) = -0.0, matching torch.nan_to_num semantics.
    n_valid = jnp.float32(K) - jnp.sum(empty.astype(jnp.float32), axis=1)  # (B,1)
    safe = jnp.where(n_valid == 1.0, jnp.float32(1.0), n_valid - 1.0)
    ratio = jnp.where(n_valid == 1.0, jnp.float32(1.0), n_valid / safe)
    V = V * ratio                                            # (B, C)

    # Single whole-block store of the attention weights.
    # TODO(synk): a lane-dense (B, K) store (K on lanes) would avoid the
    # lane-width-1 masked store, but needs a sublane->lane relayout of 16
    # values; kept the natural (B, K, 1) layout for lowering safety.
    a_out_ref[...] = attn

    # ---- classifier: relu(M @ w3_M + V @ w3_V + b3) @ w4_pad + b4_pad ----
    # (w3 split in the wrapper removes the (1, 2C) lane-axis concat.)
    h2 = jnp.maximum(
        jnp.dot(M, w3m_ref[...], preferred_element_type=jnp.float32)
        + jnp.dot(V, w3v_ref[...], preferred_element_type=jnp.float32)
        + b3_ref[...],
        0.0,
    )                                                        # (B, DIM)
    # lane-dense (B, 128) store; real logits are the first NUM_CLASSES lanes
    out_ref[...] = (
        jnp.dot(h2, w4_ref[...], preferred_element_type=jnp.float32)
        + b4_ref[...]
    )


# ---------------- one-time parameter re-layout (hoisted out of hot path) ----
def prepare_params(params):
    w1, b1, w2, b2, w3, b3, w4, b4 = params
    w2_row = w2.reshape((1, DIM))                            # VPU row for layer 2
    b2_s = b2.reshape((1,))                                  # scalar bias -> SMEM
    w3_m = w3[:C, :]                                         # (C, DIM) — M half
    w3_v = w3[C:, :]                                         # (C, DIM) — V half
    w4_pad = jnp.zeros((DIM, PAD_N), jnp.float32).at[:, :NUM_CLASSES].set(w4)
    b4_pad = jnp.zeros((1, PAD_N), jnp.float32).at[:, :NUM_CLASSES].set(b4)
    return (w1, b1, w2_row, b2_s, w3_m, w3_v, b3, w4_pad, b4_pad)


_COST = pl.CostEstimate(
    flops=(2 * B * K * C * DIM          # attention layer 1
           + 2 * B * K * DIM            # attention layer 2
           + 8 * B * K * C              # mask + mean/var elementwise & reductions
           + 4 * B * C * DIM            # classifier layer 1 (two halves)
           + 2 * B * DIM * PAD_N),      # classifier layer 2
    transcendentals=B * K * DIM + B * K,
    bytes_accessed=4 * (B * K * C + C * DIM + 2 * DIM + 1 + 2 * C * DIM
                        + DIM * PAD_N + PAD_N + B * K + B * PAD_N),
)


# ---------------- hot-path forward ------------------------------------------
@jax.jit
def varmil_forward(x, prepped):
    (w1, b1, w2_row, b2_s, w3_m, w3_v, b3, w4_pad, b4_pad) = prepped

    vmem = lambda: pl.BlockSpec(memory_space=pltpu.MemorySpace.VMEM)
    smem = lambda: pl.BlockSpec(memory_space=pltpu.MemorySpace.SMEM)

    attn, out_pad = pl.pallas_call(
        varmil_kernel,
        out_shape=(
            jax.ShapeDtypeStruct((B, K, 1), jnp.float32),    # A
            jax.ShapeDtypeStruct((B, PAD_N), jnp.float32),   # padded logits
        ),
        in_specs=[
            vmem(),                      # x            (B, K, C)
            vmem(), vmem(),              # w1, b1       attention L1
            vmem(), smem(),              # w2_row, b2   attention L2
            vmem(), vmem(), vmem(),      # w3_m, w3_v, b3  classifier L1
            vmem(), vmem(),              # w4_pad, b4_pad  classifier L2
        ],
        out_specs=(vmem(), vmem()),
        cost_estimate=_COST,
    )(x, w1, b1, w2_row, b2_s, w3_m, w3_v, b3, w4_pad, b4_pad)

    return attn, out_pad[:, :NUM_CLASSES]


# ---------------- pure-JAX reference (for correctness check) ---------------
def varmil_ref(x, params):
    w1, b1, w2, b2, w3, b3, w4, b4 = params
    a = jnp.tanh(x @ w1 + b1) @ w2 + b2                      # (B, K, 1)
    empty = jnp.all(x == 0.0, axis=2, keepdims=True)
    a = jnp.where(empty, -9e15, a)
    attn = jax.nn.softmax(a, axis=1)
    M = jnp.einsum("bkd,bko->bo", attn, x)
    S = (x - M[:, None, :]) ** 2
    V = jnp.einsum("bkd,bko->bo", attn, S)
    n = jnp.float32(K) - jnp.sum(empty[..., 0].astype(jnp.float32), axis=1)
    ratio = jnp.where(n == 1.0, 1.0, n / jnp.where(n == 1.0, 1.0, n - 1.0))
    V = V * ratio[:, None]
    MV = jnp.concatenate([M, V], axis=1)
    out = jnp.maximum(MV @ w3 + b3, 0.0) @ w4 + b4
    return attn, out


# ---------------- driver ----------------------------------------------------
def make_params(key):
    ks = jax.random.split(key, 8)
    s = 0.05
    w1 = jax.random.normal(ks[0], (C, DIM), jnp.float32) * s
    b1 = jax.random.normal(ks[1], (1, DIM), jnp.float32) * s
    w2 = jax.random.normal(ks[2], (DIM, 1), jnp.float32) * s
    b2 = jax.random.normal(ks[3], (1, 1), jnp.float32) * s
    w3 = jax.random.normal(ks[4], (2 * C, DIM), jnp.float32) * s
    b3 = jax.random.normal(ks[5], (1, DIM), jnp.float32) * s
    w4 = jax.random.normal(ks[6], (DIM, NUM_CLASSES), jnp.float32) * s
    b4 = jax.random.normal(ks[7], (1, NUM_CLASSES), jnp.float32) * s
    return (w1, b1, w2, b2, w3, b3, w4, b4)


if __name__ == "__main__":
    key = jax.random.PRNGKey(0)
    kx, kp = jax.random.split(key)
    x = jax.random.normal(kx, (B, K, C), jnp.float32)
    # Zero out a couple of patches in bag 0 to exercise the all-zero mask.
    x = x.at[0, K - 2:, :].set(0.0)
    params = make_params(kp)

    # One-time parameter re-layout, hoisted out of the per-call path.
    prepped = jax.block_until_ready(prepare_params(params))

    A, out = varmil_forward(x, prepped)
    jax.block_until_ready((A, out))
    A_ref, out_ref = varmil_ref(x, params)
    np.testing.assert_allclose(np.asarray(A), np.asarray(A_ref),
                               rtol=1e-5, atol=1e-5)
    np.testing.assert_allclose(np.asarray(out), np.asarray(out_ref),
                               rtol=1e-4, atol=1e-4)

    # Edge case from the review: a fully-empty bag (n_valid == 0).
    x2 = x.at[1].set(0.0)
    A2, out2 = varmil_forward(x2, prepped)
    jax.block_until_ready((A2, out2))
    A2_ref, out2_ref = varmil_ref(x2, params)
    np.testing.assert_allclose(np.asarray(A2), np.asarray(A2_ref),
                               rtol=1e-5, atol=1e-5)
    np.testing.assert_allclose(np.asarray(out2), np.asarray(out2_ref),
                               rtol=1e-4, atol=1e-4)

    print("KERNEL_OK")
</pallas_src>

<mosaic_0001>
module attributes {stable_mosaic.version = 11 : i64} {
  func.func @varmil_kernel(%arg0: memref<2x8x256xf32, #tpu.memory_space<vmem>>, %arg1: memref<256x128xf32, #tpu.memory_space<vmem>>, %arg2: memref<1x128xf32, #tpu.memory_space<vmem>>, %arg3: memref<1x128xf32, #tpu.memory_space<vmem>>, %arg4: memref<1xf32, #tpu.memory_space<smem>>, %arg5: memref<256x128xf32, #tpu.memory_space<vmem>>, %arg6: memref<256x128xf32, #tpu.memory_space<vmem>>, %arg7: memref<1x128xf32, #tpu.memory_space<vmem>>, %arg8: memref<128x128xf32, #tpu.memory_space<vmem>>, %arg9: memref<1x128xf32, #tpu.memory_space<vmem>>, %arg10: memref<2x8x1xf32, #tpu.memory_space<vmem>>, %arg11: memref<2x128xf32, #tpu.memory_space<vmem>>) attributes {dimension_semantics = [], scalar_prefetch = 0 : i64, scratch_operands = 0 : i64, tpu.core_type = #tpu.core_type<tc>} {
    %c0 = arith.constant 0 : index
    %c0_0 = arith.constant 0 : index
    %c0_1 = arith.constant 0 : index
    %0 = vector.load %arg0[%c0, %c0_0, %c0_1] : memref<2x8x256xf32, #tpu.memory_space<vmem>>, vector<2x8x256xf32>
    %1 = vector.shape_cast %0 : vector<2x8x256xf32> to vector<16x256xf32>
    %c0_2 = arith.constant 0 : index
    %c0_3 = arith.constant 0 : index
    %2 = vector.load %arg1[%c0_2, %c0_3] : memref<256x128xf32, #tpu.memory_space<vmem>>, vector<256x128xf32>
    %cst = arith.constant dense<0.000000e+00> : vector<16x128xf32>
    %3 = tpu.matmul %1, %2, %cst {dimension_numbers = #tpu.dot_dimension_numbers<[1], [0], [0], [1], [0, 0, 1, 1], [], []>} : vector<16x256xf32>, vector<256x128xf32>, vector<16x128xf32> -> vector<16x128xf32>
    %c0_4 = arith.constant 0 : index
    %c0_5 = arith.constant 0 : index
    %4 = vector.load %arg2[%c0_4, %c0_5] : memref<1x128xf32, #tpu.memory_space<vmem>>, vector<1x128xf32>
    %5 = vector.broadcast %4 : vector<1x128xf32> to vector<16x128xf32>
    %6 = arith.addf %3, %5 : vector<16x128xf32>
    %7 = math.tanh %6 : vector<16x128xf32>
    %8 = vector.shape_cast %7 : vector<16x128xf32> to vector<2x8x128xf32>
    %c0_6 = arith.constant 0 : index
    %c0_7 = arith.constant 0 : index
    %9 = vector.load %arg3[%c0_6, %c0_7] : memref<1x128xf32, #tpu.memory_space<vmem>>, vector<1x128xf32>
    %10 = vector.shape_cast %9 : vector<1x128xf32> to vector<1x1x128xf32>
    %11 = vector.broadcast %10 : vector<1x1x128xf32> to vector<2x8x128xf32>
    %12 = arith.mulf %8, %11 : vector<2x8x128xf32>
    %cst_8 = arith.constant dense<0.000000e+00> : vector<2x8xf32>
    %13 = vector.multi_reduction <add>, %12, %cst_8 [2] : vector<2x8x128xf32> to vector<2x8xf32>
    %14 = vector.shape_cast %13 : vector<2x8xf32> to vector<2x8x1xf32>
    %c0_9 = arith.constant 0 : index
    %15 = memref.load %arg4[%c0_9] : memref<1xf32, #tpu.memory_space<smem>>
    %16 = vector.broadcast %15 : f32 to vector<2x8x1xf32>
    %17 = arith.addf %14, %16 : vector<2x8x1xf32>
    %cst_10 = arith.constant 0.000000e+00 : f32
    %18 = vector.broadcast %cst_10 : f32 to vector<2x8x256xf32>
    %19 = arith.cmpf oeq, %0, %18 : vector<2x8x256xf32>
    %cst_11 = arith.constant 1.000000e+00 : f32
    %cst_12 = arith.constant 0.000000e+00 : f32
    %20 = vector.broadcast %cst_11 : f32 to vector<2x8x256xf32>
    %21 = vector.broadcast %cst_12 : f32 to vector<2x8x256xf32>
    %22 = arith.select %19, %20, %21 : vector<2x8x256xi1>, vector<2x8x256xf32>
    %cst_13 = arith.constant dense<0x7F800000> : vector<2x8xf32>
    %23 = vector.multi_reduction <minimumf>, %22, %cst_13 [2] : vector<2x8x256xf32> to vector<2x8xf32>
    %cst_14 = arith.constant 0.000000e+00 : f32
    %24 = vector.broadcast %cst_14 : f32 to vector<2x8xf32>
    %25 = arith.cmpf ogt, %23, %24 : vector<2x8xf32>
    %26 = vector.shape_cast %25 : vector<2x8xi1> to vector<2x8x1xi1>
    %cst_15 = arith.constant -9.000000e+15 : f32
    %27 = vector.broadcast %cst_15 : f32 to vector<2x8x1xf32>
    %28 = arith.select %26, %27, %17 : vector<2x8x1xi1>, vector<2x8x1xf32>
    %cst_16 = arith.constant dense<0xFF800000> : vector<2x1xf32>
    %29 = vector.multi_reduction <maximumf>, %28, %cst_16 [1] : vector<2x8x1xf32> to vector<2x1xf32>
    %30 = vector.shape_cast %29 : vector<2x1xf32> to vector<2x1x1xf32>
    %31 = vector.broadcast %30 : vector<2x1x1xf32> to vector<2x8x1xf32>
    %32 = arith.subf %28, %31 : vector<2x8x1xf32>
    %33 = math.exp %32 : vector<2x8x1xf32>
    %cst_17 = arith.constant dense<0.000000e+00> : vector<2x1xf32>
    %34 = vector.multi_reduction <add>, %33, %cst_17 [1] : vector<2x8x1xf32> to vector<2x1xf32>
    %35 = vector.shape_cast %34 : vector<2x1xf32> to vector<2x1x1xf32>
    %36 = tpu.reciprocal %35 : vector<2x1x1xf32> -> vector<2x1x1xf32>
    %37 = vector.broadcast %36 : vector<2x1x1xf32> to vector<2x8x1xf32>
    %38 = arith.mulf %33, %37 : vector<2x8x1xf32>
    %39 = vector.broadcast %38 : vector<2x8x1xf32> to vector<2x8x256xf32>
    %40 = arith.mulf %39, %0 : vector<2x8x256xf32>
    %cst_18 = arith.constant dense<0.000000e+00> : vector<2x256xf32>
    %41 = vector.multi_reduction <add>, %40, %cst_18 [1] : vector<2x8x256xf32> to vector<2x256xf32>
    %42 = vector.shape_cast %41 : vector<2x256xf32> to vector<2x1x256xf32>
    %43 = vector.broadcast %42 : vector<2x1x256xf32> to vector<2x8x256xf32>
    %44 = arith.subf %0, %43 : vector<2x8x256xf32>
    %45 = arith.mulf %44, %44 : vector<2x8x256xf32>
    %46 = vector.broadcast %38 : vector<2x8x1xf32> to vector<2x8x256xf32>
    %47 = arith.mulf %46, %45 : vector<2x8x256xf32>
    %cst_19 = arith.constant dense<0.000000e+00> : vector<2x256xf32>
    %48 = vector.multi_reduction <add>, %47, %cst_19 [1] : vector<2x8x256xf32> to vector<2x256xf32>
    %49 = arith.extui %26 : vector<2x8x1xi1> to vector<2x8x1xi32>
    %50 = arith.sitofp %49 : vector<2x8x1xi32> to vector<2x8x1xf32>
    %cst_20 = arith.constant dense<0.000000e+00> : vector<2x1xf32>
    %51 = vector.multi_reduction <add>, %50, %cst_20 [1] : vector<2x8x1xf32> to vector<2x1xf32>
    %cst_21 = arith.constant 8.000000e+00 : f32
    %52 = vector.broadcast %cst_21 : f32 to vector<2x1xf32>
    %53 = arith.subf %52, %51 : vector<2x1xf32>
    %cst_22 = arith.constant 1.000000e+00 : f32
    %54 = vector.broadcast %cst_22 : f32 to vector<2x1xf32>
    %55 = arith.cmpf oeq, %53, %54 : vector<2x1xf32>
    %cst_23 = arith.constant 1.000000e+00 : f32
    %56 = vector.broadcast %cst_23 : f32 to vector<2x1xf32>
    %57 = arith.subf %53, %56 : vector<2x1xf32>
    %cst_24 = arith.constant 1.000000e+00 : f32
    %58 = vector.broadcast %cst_24 : f32 to vector<2x1xf32>
    %59 = arith.select %55, %58, %57 : vector<2x1xi1>, vector<2x1xf32>
    %cst_25 = arith.constant 1.000000e+00 : f32
    %60 = vector.broadcast %cst_25 : f32 to vector<2x1xf32>
    %61 = arith.cmpf oeq, %53, %60 : vector<2x1xf32>
    %62 = arith.divf %53, %59 : vector<2x1xf32>
    %cst_26 = arith.constant 1.000000e+00 : f32
    %63 = vector.broadcast %cst_26 : f32 to vector<2x1xf32>
    %64 = arith.select %61, %63, %62 : vector<2x1xi1>, vector<2x1xf32>
    %65 = vector.broadcast %64 : vector<2x1xf32> to vector<2x256xf32>
    %66 = arith.mulf %48, %65 : vector<2x256xf32>
    %c0_27 = arith.constant 0 : index
    %c0_28 = arith.constant 0 : index
    %c0_29 = arith.constant 0 : index
    %67 = vector.load %arg10[%c0_27, %c0_28, %c0_29] : memref<2x8x1xf32, #tpu.memory_space<vmem>>, vector<2x8x1xf32>
    tpu.vector_store %arg10[%c0_27, %c0_28, %c0_29], %38 {strides = array<i32>} : memref<2x8x1xf32, #tpu.memory_space<vmem>>, vector<2x8x1xf32>,
    %c0_30 = arith.constant 0 : index
    %c0_31 = arith.constant 0 : index
    %68 = vector.load %arg5[%c0_30, %c0_31] : memref<256x128xf32, #tpu.memory_space<vmem>>, vector<256x128xf32>
    %cst_32 = arith.constant dense<0.000000e+00> : vector<2x128xf32>
    %69 = tpu.matmul %41, %68, %cst_32 {dimension_numbers = #tpu.dot_dimension_numbers<[1], [0], [0], [1], [0, 0, 1, 1], [], []>} : vector<2x256xf32>, vector<256x128xf32>, vector<2x128xf32> -> vector<2x128xf32>
    %c0_33 = arith.constant 0 : index
    %c0_34 = arith.constant 0 : index
    %70 = vector.load %arg6[%c0_33, %c0_34] : memref<256x128xf32, #tpu.memory_space<vmem>>, vector<256x128xf32>
    %cst_35 = arith.constant dense<0.000000e+00> : vector<2x128xf32>
    %71 = tpu.matmul %66, %70, %cst_35 {dimension_numbers = #tpu.dot_dimension_numbers<[1], [0], [0], [1], [0, 0, 1, 1], [], []>} : vector<2x256xf32>, vector<256x128xf32>, vector<2x128xf32> -> vector<2x128xf32>
    %72 = arith.addf %69, %71 : vector<2x128xf32>
    %c0_36 = arith.constant 0 : index
    %c0_37 = arith.constant 0 : index
    %73 = vector.load %arg7[%c0_36, %c0_37] : memref<1x128xf32, #tpu.memory_space<vmem>>, vector<1x128xf32>
    %74 = vector.broadcast %73 : vector<1x128xf32> to vector<2x128xf32>
    %75 = arith.addf %72, %74 : vector<2x128xf32>
    %cst_38 = arith.constant 0.000000e+00 : f32
    %76 = vector.broadcast %cst_38 : f32 to vector<2x128xf32>
    %77 = arith.maximumf %75, %76 : vector<2x128xf32>
    %c0_39 = arith.constant 0 : index
    %c0_40 = arith.constant 0 : index
    %78 = vector.load %arg8[%c0_39, %c0_40] : memref<128x128xf32, #tpu.memory_space<vmem>>, vector<128x128xf32>
    %cst_41 = arith.constant dense<0.000000e+00> : vector<2x128xf32>
    %79 = tpu.matmul %77, %78, %cst_41 {dimension_numbers = #tpu.dot_dimension_numbers<[1], [0], [0], [1], [0, 0, 1, 1], [], []>} : vector<2x128xf32>, vector<128x128xf32>, vector<2x128xf32> -> vector<2x128xf32>
    %c0_42 = arith.constant 0 : index
    %c0_43 = arith.constant 0 : index
    %80 = vector.load %arg9[%c0_42, %c0_43] : memref<1x128xf32, #tpu.memory_space<vmem>>, vector<1x128xf32>
    %81 = vector.broadcast %80 : vector<1x128xf32> to vector<2x128xf32>
    %82 = arith.addf %79, %81 : vector<2x128xf32>
    %c0_44 = arith.constant 0 : index
    %c0_45 = arith.constant 0 : index
    %83 = vector.load %arg11[%c0_44, %c0_45] : memref<2x128xf32, #tpu.memory_space<vmem>>, vector<2x128xf32>
    tpu.vector_store %arg11[%c0_44, %c0_45], %82 {strides = array<i32>} : memref<2x128xf32, #tpu.memory_space<vmem>>, vector<2x128xf32>,
    return
  }
}

</mosaic_0001>

<bundles_post_ra>
// kernel: varmil_forward.1
= control target key start
LH: loop header
LB: loop body
LE: loop exit
PB: predicated region body
PF: predicated region fallthrough
CT: control target
= control target key end

     0   :  { %18 = vsyncpa [#allocation4], 0  ;;  %s1442_s0 = inlined_call_operand.hbm [shape: f32[2,8,256], index: 0, kind: input, shape index: {}]   ;;  %s1443_s1 = inlined_call_operand.hbm [shape: f32[256,128], index: 1, kind: input, shape index: {}]   ;;  %s1444_s2 = inlined_call_operand.vmem [shape: f32[1,128], index: 2, kind: input, shape index: {}]   ;;  %s1445_s3 = inlined_call_operand.vmem [shape: f32[1,128], index: 3, kind: input, shape index: {}]   ;;  %s1446_s4 = inlined_call_operand.<no memory space> [shape: f32[1], index: 4, kind: input, shape index: {}]   ;;  %s1447_s5 = inlined_call_operand.hbm [shape: f32[256,128], index: 5, kind: input, shape index: {}]   ;;  %s1448_s6 = inlined_call_operand.hbm [shape: f32[256,128], index: 6, kind: input, shape index: {}]   ;;  %s1449_s7 = inlined_call_operand.vmem [shape: f32[1,128], index: 7, kind: input, shape index: {}]   ;;  %s1450_s8 = inlined_call_operand.hbm [shape: f32[128,128], index: 8, kind: input, shape index: {}]   ;;  %s1451_s9 = inlined_call_operand.vmem [shape: f32[1,128], index: 9, kind: input, shape index: {}]   ;;  %s1452_s10 = inlined_call_operand.vmem [shape: f32[2,8,1], index: 10, kind: output, shape index: {0}]   ;;  %s1453_s11 = inlined_call_operand.hbm [shape: f32[2,128], index: 11, kind: output, shape index: {1}]  }
   0x1   :  { %19 = vsyncpa [#allocation7], 0 }
   0x2   :  { %20 = vsyncpa [#allocation10], 0 }
   0x3   :  { %21 = vsyncpa [#allocation5], 0  ;;  %s1199_s17 = smov [#allocation6]   ;;  %s1059_s21 = scalar_lea.hbm %s1443_s1, 4096 }
   0x4   :  { %s39_s18 = sshll.u32 %s1199_s17, 4  ;;  %p1060_p0 = scmp.ne.s32.totalorder %s1443_s1, %s1059_s21  ;;  %s40_s18 = int_to_ptr.vmem [resolvable:$true] %s39_s18 }
   0x5   :  { %p1063_p1 = scmp.lt.u32.totalorder %s1059_s21, %s1443_s1 }
   0x7   :  { %p1065_p2 = pnand %p1063_p1, %p1060_p0 }
   0x9   :  { %1068 = shalt.err (!%p1065_p2)
}
   0xa   :  { %s1069_s26 = scalar_lea.vmem %s40_s18, 4096  ;;  %p1074_p4 = scmp.lt.s32.totalorder %s40_s18, %s40_s18 }
   0xb   :  { %p1070_p3 = scmp.ne.s32.totalorder %s40_s18, %s1069_s26  ;;  %p1075_p5 = scmp.lt.s32.totalorder %s1069_s26, %s1069_s26 }
   0xd   :  { %p1076_p6 = por %p1075_p5, %p1074_p4 }
   0xf   :  { %p1077_p7 = pnand %p1076_p6, %p1070_p3 }
  0x11   :  { %1080 = shalt.err (!%p1077_p7)
}
  0x12   :  { %s1200_s27 = smov 128   ;;  %s1201_s28 = smov 8  }
  0x13   :  { %45 = dma.hbm_to_vmem [thread:$0]  %s1443_s1, 4096, %s40_s18, [#allocation7], %s1200_s27, %s1200_s27, %s1201_s28  }
  0x14   :  { %s1202_s12 = smov [#allocation9]   ;;  %s1203_s14 = smov [#allocation3]  }
  0x15   :  { %s69_s13 = sshll.u32 %s1202_s12, 4  ;;  %s27_s15 = sshll.u32 %s1203_s14, 4  ;;  %s70_s13 = int_to_ptr.vmem [resolvable:$true] %s69_s13  ;;  %s28_s15 = int_to_ptr.vmem [resolvable:$true] %s27_s15 }
  0x16   :  { %s1081_s19 = scalar_lea.hbm %s1448_s6, 4096 }
  0x17   :  { %p1082_p8 = scmp.ne.s32.totalorder %s1448_s6, %s1081_s19  ;;  %p1085_p9 = scmp.lt.u32.totalorder %s1081_s19, %s1448_s6 }
  0x19   :  { %p1087_p10 = pnand %p1085_p9, %p1082_p8 }
  0x1b   :  { %1090 = shalt.err (!%p1087_p10)
}
  0x1c   :  { %s1091_s1 = scalar_lea.vmem %s70_s13, 4096  ;;  %p1096_p12 = scmp.lt.s32.totalorder %s70_s13, %s70_s13 }
  0x1d   :  { %p1092_p11 = scmp.ne.s32.totalorder %s70_s13, %s1091_s1  ;;  %p1097_p13 = scmp.lt.s32.totalorder %s1091_s1, %s1091_s1 }
  0x1f   :  { %p1098_p0 = por %p1097_p13, %p1096_p12 }
  0x21   :  { %p1099_p1 = pnand %p1098_p0, %p1092_p11 }
  0x23   :  { %1102 = shalt.err (!%p1099_p1)
}
  0x24   :  { %75 = dma.hbm_to_vmem [thread:$0]  %s1448_s6, 4096, %s70_s13, [#allocation10], %s1200_s27, %s1200_s27, %s1201_s28  }
  0x25   :  { %s1103_s29 = scalar_lea.hbm %s1442_s0, 512 }
  0x26   :  { %p1104_p2 = scmp.ne.s32.totalorder %s1442_s0, %s1103_s29  ;;  %p1107_p3 = scmp.lt.u32.totalorder %s1103_s29, %s1442_s0 }
  0x28   :  { %p1109_p4 = pnand %p1107_p3, %p1104_p2 }
  0x2a   :  { %1112 = shalt.err (!%p1109_p4)
}
  0x2b   :  { %s1113_s17 = scalar_lea.vmem %s28_s15, 512  ;;  %p1118_p6 = scmp.lt.s32.totalorder %s28_s15, %s28_s15 }
  0x2c   :  { %p1114_p5 = scmp.ne.s32.totalorder %s28_s15, %s1113_s17  ;;  %p1119_p7 = scmp.lt.s32.totalorder %s1113_s17, %s1113_s17 }
  0x2e   :  { %p1120_p8 = por %p1119_p7, %p1118_p6 }
  0x30   :  { %p1121_p9 = pnand %p1120_p8, %p1114_p5 }
  0x32   :  { %1124 = shalt.err (!%p1121_p9)
}
  0x33   :  { %s1204_s6 = smov 256   ;;  %s1205_s13 = smov 16  }
  0x34   :  { %33 = dma.hbm_to_vmem [thread:$0]  %s1442_s0, 512, %s28_s15, [#allocation4], %s1204_s6, %s1204_s6, %s1205_s13  }
  0x35   :  { %s1206_s21 = smov [#allocation8]   ;;  %s1207_s23 = smov [#allocation11]  }
  0x36   :  { %s57_s22 = sshll.u32 %s1206_s21, 4  ;;  %s83_s1 = sshll.u32 %s1207_s23, 4  ;;  %s58_s22 = int_to_ptr.vmem [resolvable:$true] %s57_s22  ;;  %s84_s1 = int_to_ptr.vmem [resolvable:$true] %s83_s1 }
  0x37   :  { %s1125_s25 = scalar_lea.hbm %s1447_s5, 4096 }
  0x38   :  { %p1126_p10 = scmp.ne.s32.totalorder %s1447_s5, %s1125_s25  ;;  %p1129_p11 = scmp.lt.u32.totalorder %s1125_s25, %s1447_s5 }
  0x3a   :  { %p1131_p12 = pnand %p1129_p11, %p1126_p10 }
  0x3c   :  { %1134 = shalt.err (!%p1131_p12)
}
  0x3d   :  { %s1135_s0 = scalar_lea.vmem %s58_s22, 4096  ;;  %p1140_p0 = scmp.lt.s32.totalorder %s58_s22, %s58_s22 }
  0x3e   :  { %p1136_p13 = scmp.ne.s32.totalorder %s58_s22, %s1135_s0  ;;  %p1141_p1 = scmp.lt.s32.totalorder %s1135_s0, %s1135_s0 }
  0x40   :  { %p1142_p2 = por %p1141_p1, %p1140_p0 }
  0x42   :  { %p1143_p3 = pnand %p1142_p2, %p1136_p13 }
  0x44   :  { %1146 = shalt.err (!%p1143_p3)
}
  0x45   :  { %63 = dma.hbm_to_vmem [thread:$0]  %s1447_s5, 4096, %s58_s22, [#allocation7], %s1200_s27, %s1200_s27, %s1201_s28  }
  0x46   :  { %s1147_s6 = scalar_lea.hbm %s1450_s8, 2048 }
  0x47   :  { %p1148_p4 = scmp.ne.s32.totalorder %s1450_s8, %s1147_s6  ;;  %p1151_p5 = scmp.lt.u32.totalorder %s1147_s6, %s1450_s8 }
  0x49   :  { %p1153_p6 = pnand %p1151_p5, %p1148_p4 }
  0x4b   :  { %1156 = shalt.err (!%p1153_p6)
}
  0x4c   :  { %s1157_s23 = scalar_lea.vmem %s84_s1, 2048  ;;  %p1162_p8 = scmp.lt.s32.totalorder %s84_s1, %s84_s1 }
  0x4d   :  { %p1158_p7 = scmp.ne.s32.totalorder %s84_s1, %s1157_s23  ;;  %p1163_p9 = scmp.lt.s32.totalorder %s1157_s23, %s1157_s23 }
  0x4f   :  { %p1164_p10 = por %p1163_p9, %p1162_p8 }
  0x51   :  { %p1165_p11 = pnand %p1164_p10, %p1158_p7 }
  0x53   :  { %1168 = shalt.err (!%p1165_p11)
}
  0x54   :  { %89 = dma.hbm_to_vmem [thread:$0]  %s1450_s8, 2048, %s84_s1, [#allocation10], %s1200_s27, %s1200_s27, %s1201_s28  }
  0x55   :  { %1191 = dma.done.wait [#allocation4], 512  }
  0x56   :  { %1192 = vsyncadd [#allocation4], 4294966784 }
  0x57   :  { %1193 = dma.done.wait [#allocation7], 8192  }
  0x58   :  { %1194 = vsyncadd [#allocation7], 4294959104 }
  0x59   :  { %1195 = dma.done.wait [#allocation10], 6144  }
  0x5a   :  { %1196 = vsyncadd [#allocation10], 4294961152  ;;  %v127_v0 = vld [vmem:[#allocation6 + $0x80] sm:$0xff]  ;;  %v128_v1 = vld [vmem:[#allocation6 + $0x88] sm:$0xff]  ;;  %v1208_v28 = vmov 0.0   ;;  %vm394_vm6 = vcmask 7168  }
  0x5b   :  { %v111_v2 = vld [vmem:[#allocation6] sm:$0xff]  ;;  %v910_v3 = vpack.c.bf16 %v128_v1, %v127_v0  ;;  %v112_v4 = vld [vmem:[#allocation6 + $0x8] sm:$0xff]  ;;  %v129_v5 = vld [vmem:[#allocation6 + $0x90] sm:$0xff]  ;;  %vm465_vm9 = vcmask 1041409   ;;  %vm1210_vm10 = vmmov 0   ;;  %s1211_s12 = smov [#allocation12]  }
  0x5c   :  { %v130_v6 = vld [vmem:[#allocation6 + $0x98] sm:$0xff]  ;;  %v912_v7 = vpack.c.bf16 %v112_v4, %v111_v2  ;;  %v113_v9 = vld [vmem:[#allocation6 + $0x10] sm:$0xff]  ;;  %v131_v11 = vld [vmem:[#allocation6 + $0xa0] sm:$0xff]  ;;  %s729_s0 = sshll.u32 %s1211_s12, 4  ;;  %s730_s0 = int_to_ptr.vmem [resolvable:$true] %s729_s0 }
  0x5d   :  { %v914_v8 = vpack.c.bf16 %v130_v6, %v129_v5  ;;  %v114_v10 = vld [vmem:[#allocation6 + $0x18] sm:$0xff]  ;;  %911 = vmatprep.subr.bf16.mxu0 %v910_v3  ;;  %v132_v12 = vld [vmem:[#allocation6 + $0xa8] sm:$0xff]  ;;  %v115_v15 = vld [vmem:[#allocation6 + $0x20] sm:$0xff]  ;;  %s1169_s15 = scalar_lea.vmem %s730_s0, 32  ;;  %p1174_p13 = scmp.lt.s32.totalorder %s730_s0, %s730_s0 }
  0x5e   :  { %913 = vmatpush3.bf16.msra.mxu0 %v912_v7  ;;  %v916_v13 = vpack.c.bf16 %v114_v10, %v113_v9  ;;  %v918_v14 = vpack.c.bf16 %v132_v12, %v131_v11  ;;  %v116_v16 = vld [vmem:[#allocation6 + $0x28] sm:$0xff]  ;;  %v133_v17 = vld [vmem:[#allocation6 + $0xb0] sm:$0xff]  ;;  %v134_v18 = vld [vmem:[#allocation6 + $0xb8] sm:$0xff]  ;;  %p1170_p12 = scmp.ne.s32.totalorder %s730_s0, %s1169_s15  ;;  %p1175_p0 = scmp.lt.s32.totalorder %s1169_s15, %s1169_s15 }
  0x5f   :  { %915 = vmatprep.subr.bf16.mxu0 %v914_v8  ;;  %v920_v19 = vpack.c.bf16 %v116_v16, %v115_v15  ;;  %v922_v20 = vpack.c.bf16 %v134_v18, %v133_v17  ;;  %v117_v21 = vld [vmem:[#allocation6 + $0x30] sm:$0xff]  ;;  %v118_v22 = vld [vmem:[#allocation6 + $0x38] sm:$0xff]  ;;  %v135_v23 = vld [vmem:[#allocation6 + $0xc0] sm:$0xff] }
  0x60   :  { %v136_v24 = vld [vmem:[#allocation6 + $0xc8] sm:$0xff]  ;;  %v1347_v26 = vld [vmem:[#allocation3] sm:$0xff]  ;;  %v924_v27 = vpack.c.bf16 %v118_v22, %v117_v21  ;;  %v137_v34 = vld [vmem:[#allocation6 + $0xd0] sm:$0xff]  ;;  %p1176_p1 = por %p1175_p0, %p1174_p13 }
  0x61   :  { %v1344_v25 = vld [vmem:[#allocation3 + $0x8] sm:$0xff]  ;;  %vm244_vm1 = vcmp.eq.f32.partialorder %v1347_v26, 0.0  ;;  %v926_v30 = vpack.c.bf16 %v136_v24, %v135_v23  ;;  %v119_v31 = vld [vmem:[#allocation6 + $0x40] sm:$0xff]  ;;  %v138_v35 = vld [vmem:[#allocation6 + $0xd8] sm:$0xff] }
  0x62   :  { %917 = vmatpush3.bf16.msra.mxu0 %v916_v13  ;;  %214 = vmatprep.mubr.f32.mxu0 %v1344_v25  ;;  %vm245_vm0 = vcmp.eq.f32.partialorder %v1344_v25, 0.0  ;;  %v120_v32 = vld [vmem:[#allocation6 + $0x48] sm:$0xff]  ;;  %v248_v33 = vsel %vm244_vm1, 1.0, %v1208_v28  ;;  %v930_v38 = vpack.c.bf16 %v138_v35, %v137_v34  ;;  %v121_v39 = vld [vmem:[#allocation6 + $0x50] sm:$0xff]  ;;  %v122_v40 = vld [vmem:[#allocation6 + $0x58] sm:$0xff]  ;;  %p1177_p2 = pnand %p1176_p1, %p1170_p12 }
  0x63   :  { %919 = vmatprep.subr.bf16.mxu0 %v918_v14  ;;  %v249_v29 = vsel %vm245_vm0, 1.0, %v1208_v28  ;;  %v928_v37 = vpack.c.bf16 %v120_v32, %v119_v31  ;;  %v139_v41 = vld [vmem:[#allocation6 + $0xe0] sm:$0xff]  ;;  %v140_v42 = vld [vmem:[#allocation6 + $0xe8] sm:$0xff]  ;;  %v932_v43 = vpack.c.bf16 %v122_v40, %v121_v39  ;;  %v141_v47 = vld [vmem:[#allocation6 + $0xf0] sm:$0xff] }
  0x64   :  { %v252_v36 = vmin.f32 %v248_v33, %v249_v29  ;;  %v934_v44 = vpack.c.bf16 %v140_v42, %v139_v41  ;;  %v123_v45 = vld [vmem:[#allocation6 + $0x60] sm:$0xff]  ;;  %v124_v46 = vld [vmem:[#allocation6 + $0x68] sm:$0xff]  ;;  %v142_v48 = vld [vmem:[#allocation6 + $0xf8] sm:$0xff] }
  0x65   :  { %v936_v49 = vpack.c.bf16 %v124_v46, %v123_v45  ;;  %v938_v50 = vpack.c.bf16 %v142_v48, %v141_v47  ;;  %v125_v51 = vld [vmem:[#allocation6 + $0x70] sm:$0xff]  ;;  %v126_v52 = vld [vmem:[#allocation6 + $0x78] sm:$0xff]  ;;  %v742_v60 = vld [vmem:[%s1444_s2] ss:$0 sm:$0xff] }
  0x66   :  { %921 = vmatpush3.bf16.msra.mxu0 %v920_v19  ;;  %253 = vmin.xlane.f32.xlu1 %v252_v36  ;;  %v940_v53 = vpack.c.bf16 %v126_v52, %v125_v51  ;;  %v1353_v54 = vld [vmem:[#allocation3 + $0x18] sm:$0xff]  ;;  %v1357_v55 = vld [vmem:[#allocation3 + $0x10] sm:$0xff]  ;;  %v743_v4 = vld [vmem:[%s1445_s3] ss:$0 sm:$0xff] }
  0x67   :  { %923 = vmatprep.subr.bf16.mxu0 %v922_v20  ;;  %vm246_vm2 = vcmp.eq.f32.partialorder %v1357_v55, 0.0  ;;  %vm247_vm3 = vcmp.eq.f32.partialorder %v1353_v54, 0.0  ;;  %v413_v9 = vld [vmem:[#allocation8 + $0x80] sm:$0xff]  ;;  %v414_v10 = vld [vmem:[#allocation8 + $0x88] sm:$0xff]  ;;  %v415_v15 = vld [vmem:[#allocation8 + $0x90] sm:$0xff] }
  0x68   :  { %v250_v56 = vsel %vm246_vm2, 1.0, %v1208_v28  ;;  %v251_v57 = vsel %vm247_vm3, 1.0, %v1208_v28  ;;  %v974_v11 = vpack.c.bf16 %v414_v10, %v413_v9  ;;  %v397_v12 = vld [vmem:[#allocation8] sm:$0xff]  ;;  %v398_v13 = vld [vmem:[#allocation8 + $0x8] sm:$0xff]  ;;  %v416_v16 = vld [vmem:[#allocation8 + $0x98] sm:$0xff] }
  0x69   :  { %v255_v58 = vmin.f32 %v250_v56, %v251_v57  ;;  %v976_v14 = vpack.c.bf16 %v398_v13, %v397_v12  ;;  %v399_v17 = vld [vmem:[#allocation8 + $0x10] sm:$0xff]  ;;  %v978_v18 = vpack.c.bf16 %v416_v16, %v415_v15  ;;  %v400_v19 = vld [vmem:[#allocation8 + $0x18] sm:$0xff]  ;;  %v417_v20 = vld [vmem:[#allocation8 + $0xa0] sm:$0xff] }
  0x6a   :  { %925 = vmatpush3.bf16.msra.mxu0 %v924_v27  ;;  %v418_v21 = vld [vmem:[#allocation8 + $0xa8] sm:$0xff]  ;;  %v980_v22 = vpack.c.bf16 %v400_v19, %v399_v17  ;;  %v401_v24 = vld [vmem:[#allocation8 + $0x20] sm:$0xff]  ;;  %v419_v29 = vld [vmem:[#allocation8 + $0xb0] sm:$0xff] }
  0x6b   :  { %927 = vmatprep.subr.bf16.mxu0 %v926_v30  ;;  %256 = vmin.xlane.f32.xlu1 %v255_v58  ;;  %v982_v23 = vpack.c.bf16 %v418_v21, %v417_v20  ;;  %v402_v27 = vld [vmem:[#allocation8 + $0x28] sm:$0xff]  ;;  %v420_v30 = vld [vmem:[#allocation8 + $0xb8] sm:$0xff]  ;;  %v403_v32 = vld [vmem:[#allocation8 + $0x30] sm:$0xff] }
  0x6c   :  { %v984_v31 = vpack.c.bf16 %v402_v27, %v401_v24  ;;  %v986_v33 = vpack.c.bf16 %v420_v30, %v419_v29  ;;  %v404_v34 = vld [vmem:[#allocation8 + $0x38] sm:$0xff]  ;;  %v445_v35 = vld [vmem:[#allocation9 + $0x80] sm:$0xff]  ;;  %v446_v36 = vld [vmem:[#allocation9 + $0x88] sm:$0xff] }
  0x6d   :  { %v942_v39 = vpack.c.bf16 %v446_v36, %v445_v35  ;;  %v429_v40 = vld [vmem:[#allocation9] sm:$0xff]  ;;  %v430_v41 = vld [vmem:[#allocation9 + $0x8] sm:$0xff]  ;;  %v988_v42 = vpack.c.bf16 %v404_v34, %v403_v32  ;;  %v447_v45 = vld [vmem:[#allocation9 + $0x90] sm:$0xff] }
  0x6e   :  { %929 = vmatpush3.bf16.msra.mxu0 %v928_v37  ;;  %v421_v37 = vld [vmem:[#allocation8 + $0xc0] sm:$0xff]  ;;  %v448_v46 = vld [vmem:[#allocation9 + $0x98] sm:$0xff]  ;;  %v406_v48 = vld [vmem:[#allocation8 + $0x48] sm:$0xff] }
  0x6f   :  { %931 = vmatprep.subr.bf16.mxu0 %v930_v38  ;;  %v422_v38 = vld [vmem:[#allocation8 + $0xc8] sm:$0xff]  ;;  %943 = vmatprep.subr.bf16.mxu1 %v942_v39  ;;  %v432_v51 = vld [vmem:[#allocation9 + $0x18] sm:$0xff]  ;;  %v423_v52 = vld [vmem:[#allocation8 + $0xd0] sm:$0xff] }
  0x70   :  { %v990_v47 = vpack.c.bf16 %v422_v38, %v421_v37  ;;  %v449_v57 = vld [vmem:[#allocation9 + $0xa0] sm:$0xff]  ;;  %v450_v58 = vld [vmem:[#allocation9 + $0xa8] sm:$0xff]  ;;  %v427_v9 = vld [vmem:[#allocation8 + $0xf0] sm:$0xff] }
  0x71   :  { %v428_v10 = vld [vmem:[#allocation8 + $0xf8] sm:$0xff]  ;;  %v411_v13 = vld [vmem:[#allocation8 + $0x70] sm:$0xff]  ;;  %v437_v24 = vld [vmem:[#allocation9 + $0x40] sm:$0xff] }
  0x72   :  { %933 = vmatpush3.bf16.msra.mxu0 %v932_v43  ;;  %v405_v43 = vld [vmem:[#allocation8 + $0x40] sm:$0xff]  ;;  %v1002_v12 = vpack.c.bf16 %v428_v10, %v427_v9  ;;  %v451_v16 = vld [vmem:[#allocation9 + $0xb0] sm:$0xff]  ;;  %v452_v17 = vld [vmem:[#allocation9 + $0xb8] sm:$0xff] }
  0x73   :  { %935 = vmatprep.subr.bf16.mxu0 %v934_v44  ;;  %v944_v44 = vpack.c.bf16 %v430_v41, %v429_v40  ;;  %v435_v19 = vld [vmem:[#allocation9 + $0x30] sm:$0xff]  ;;  %v436_v20 = vld [vmem:[#allocation9 + $0x38] sm:$0xff]  ;;  %v438_v29 = vld [vmem:[#allocation9 + $0x48] sm:$0xff] }
  0x74   :  { %v956_v21 = vpack.c.bf16 %v436_v20, %v435_v19  ;;  %v455_v30 = vld [vmem:[#allocation9 + $0xd0] sm:$0xff]  ;;  %v960_v32 = vpack.c.bf16 %v438_v29, %v437_v24  ;;  %v440_v35 = vld [vmem:[#allocation9 + $0x58] sm:$0xff]  ;;  %v457_v36 = vld [vmem:[#allocation9 + $0xe0] sm:$0xff] }
  0x75   :  { %945 = vmatpush3.bf16.msra.mxu1 %v944_v44  ;;  %v439_v34 = vld [vmem:[#allocation9 + $0x50] sm:$0xff]  ;;  %v458_v37 = vld [vmem:[#allocation9 + $0xe8] sm:$0xff]  ;;  %v441_v40 = vld [vmem:[#allocation9 + $0x60] sm:$0xff] }
  0x76   :  { %937 = vmatpush3.bf16.msra.mxu0 %v936_v49  ;;  %v946_v49 = vpack.c.bf16 %v448_v46, %v447_v45  ;;  %v964_v38 = vpack.c.bf16 %v440_v35, %v439_v34  ;;  %v966_v39 = vpack.c.bf16 %v458_v37, %v457_v36  ;;  %v442_v41 = vld [vmem:[#allocation9 + $0x68] sm:$0xff]  ;;  %v443_v46 = vld [vmem:[#allocation9 + $0x70] sm:$0xff] }
  0x77   :  { %939 = vmatprep.subr.bf16.mxu0 %v938_v50  ;;  %v431_v50 = vld [vmem:[#allocation9 + $0x10] sm:$0xff]  ;;  %v968_v44 = vpack.c.bf16 %v442_v41, %v441_v40 }
  0x78   :  { %v948_v56 = vpack.c.bf16 %v432_v51, %v431_v50  ;;  %947 = vmatprep.subr.bf16.mxu1 %v946_v49  ;;  %v1209_v49 = vmov 0.0|0.0   ;;  %v241_v51 = vstv %s1446_s4 }
  0x7a   :  { %941 = vmatpush3.bf16.msra.mxu0 %v940_v53  ;;  %v424_v53 = vld [vmem:[#allocation8 + $0xd8] sm:$0xff]  ;;  %949 = vmatpush3.bf16.msra.mxu1 %v948_v56 }
  0x7b   :  { %975 = vmatprep.subr.bf16.mxu0 %v974_v11 }
  0x7d   :  { %215 = vmatmul.mubr.f32.vlgmr.msra.gmra.mrb[0].mxu0 %v1347_v26 }
  0x7e   :  { %219 = vmatprep.mubr.f32.mxu0 %v1353_v54  ;;  %977 = vmatpush3.bf16.msra.mxu0 %v976_v14  ;;  %v412_v14 = vld [vmem:[#allocation8 + $0x78] sm:$0xff] }
  0x7f   :  { %979 = vmatprep.subr.bf16.mxu0 %v978_v18  ;;  %v1004_v15 = vpack.c.bf16 %v412_v14, %v411_v13  ;;  %v954_v18 = vpack.c.bf16 %v452_v17, %v451_v16 }
  0x81   :  { %220 = vmatmul.mubr.f32.gmra.mrb[2].mxu0 %v1357_v55 }
  0x82   :  { %981 = vmatpush3.bf16.msra.mxu0 %v980_v22  ;;  %v453_v22 = vld [vmem:[#allocation9 + $0xc0] sm:$0xff] }
  0x83   :  { %983 = vmatprep.subr.bf16.mxu0 %v982_v23  ;;  %v454_v23 = vld [vmem:[#allocation9 + $0xc8] sm:$0xff] }
  0x84   :  { %v958_v27 = vpack.c.bf16 %v454_v23, %v453_v22 }
  0x86   :  { %985 = vmatpush3.bf16.msra.mxu0 %v984_v31  ;;  %v456_v31 = vld [vmem:[#allocation9 + $0xd8] sm:$0xff] }
  0x87   :  { %987 = vmatprep.subr.bf16.mxu0 %v986_v33  ;;  %v962_v33 = vpack.c.bf16 %v456_v31, %v455_v30 }
  0x8a   :  { %989 = vmatpush3.bf16.msra.mxu0 %v988_v42  ;;  %v459_v42 = vld [vmem:[#allocation9 + $0xf0] sm:$0xff] }
  0x8b   :  { %991 = vmatprep.subr.bf16.mxu0 %v990_v47  ;;  %v444_v47 = vld [vmem:[#allocation9 + $0x78] sm:$0xff] }
  0xf3   :  { %v254_v50 = vpop.xlane.xlu1 %253 }
  0xf4   :  { %vm258_vm4 = vcmp.gt.f32.partialorder %v254_v50, 0.0 }
  0xf8   :  { %v257_v56 = vpop.xlane.xlu1 %256 }
  0xf9   :  { %vm259_vm5 = vcmp.gt.f32.partialorder %v257_v56, 0.0 }
 0x150   :  { %v782_v59 = vpop.f32.mrb[0].mxu0 }
 0x151   :  { %v783_v61 = vpop.f32.mrb[1].mxu0 }
 0x152   :  { %v784_v62 = vadd.f32 %v783_v61, %v782_v59  ;;  %v992_v59 = vpack.c.bf16 %v406_v48, %v405_v43  ;;  %v433_v61 = vld [vmem:[#allocation9 + $0x20] sm:$0xff]  ;;  %v460_v43 = vld [vmem:[#allocation9 + $0xf8] sm:$0xff]  ;;  %v972_v48 = vpack.c.bf16 %v444_v47, %v443_v46 }
 0x153   :  { %v970_v45 = vpack.c.bf16 %v460_v43, %v459_v42 }
 0x154   :  { %v217_v63 = vadd.f32 %v784_v62, %v742_v60  ;;  %v785_v0 = vpop.f32.mrb[2].mxu0  ;;  %v434_v62 = vld [vmem:[#allocation9 + $0x28] sm:$0xff]  ;;  %993 = vmatpush3.bf16.msra.mxu0 %v992_v59 }
 0x155   :  { %v786_v1 = vpop.f32.mrb[3].mxu0 }
 0x156   :  { %1043 = vtanh.f32 %v217_v63  ;;  %v787_v2 = vadd.f32 %v786_v1, %v785_v0  ;;  %v994_v63 = vpack.c.bf16 %v424_v53, %v423_v52  ;;  %v407_v0 = vld [vmem:[#allocation8 + $0x50] sm:$0xff]  ;;  %v408_v1 = vld [vmem:[#allocation8 + $0x58] sm:$0xff] }
 0x158   :  { %v222_v3 = vadd.f32 %v787_v2, %v742_v60  ;;  %v950_v60 = vpack.c.bf16 %v450_v58, %v449_v57  ;;  %v425_v2 = vld [vmem:[#allocation8 + $0xe0] sm:$0xff]  ;;  %995 = vmatprep.subr.bf16.mxu0 %v994_v63 }
 0x15a   :  { %1045 = vtanh.f32 %v222_v3  ;;  %v426_v3 = vld [vmem:[#allocation8 + $0xe8] sm:$0xff]  ;;  %951 = vmatprep.subr.bf16.mxu1 %v950_v60 }
 0x160   :  { %v1044_v5 = vpop.eup %1043 }
 0x161   :  { %v234_v6 = vmul.f32 %v1044_v5, %v743_v4  ;;  %v996_v5 = vpack.c.bf16 %v408_v1, %v407_v0 }
 0x163   :  { %236 = vadd.xlane.f32.xlu0 %v234_v6  ;;  %v998_v6 = vpack.c.bf16 %v426_v3, %v425_v2  ;;  %997 = vmatpush3.bf16.msra.mxu0 %v996_v5 }
 0x164   :  { %v1046_v7 = vpop.eup %1045 }
 0x165   :  { %v235_v8 = vmul.f32 %v1046_v7, %v743_v4  ;;  %v952_v4 = vpack.c.bf16 %v434_v62, %v433_v61  ;;  %v409_v7 = vld [vmem:[#allocation8 + $0x60] sm:$0xff]  ;;  %999 = vmatprep.subr.bf16.mxu0 %v998_v6 }
 0x167   :  { %238 = vadd.xlane.f32.xlu0 %v235_v8  ;;  %v410_v8 = vld [vmem:[#allocation8 + $0x68] sm:$0xff]  ;;  %953 = vmatpush3.bf16.msra.mxu1 %v952_v4 }
 0x168   :  { %v1000_v11 = vpack.c.bf16 %v410_v8, %v409_v7  ;;  %955 = vmatprep.subr.bf16.mxu1 %v954_v18  ;;  %v745_v18 = vsel %vm259_vm5, 1.0, %v1208_v28 }
 0x169   :  { %v370_v22 = vrot.slane %v745_v18, 4 }
 0x16a   :  { %1001 = vmatpush3.bf16.msra.mxu0 %v1000_v11 }
 0x16b   :  { %1003 = vmatprep.subr.bf16.mxu0 %v1002_v12  ;;  %957 = vmatpush3.bf16.msra.mxu1 %v956_v21  ;;  %v371_v31 = vadd.f32 %v745_v18, %v370_v22 }
 0x16c   :  { %959 = vmatprep.subr.bf16.mxu1 %v958_v27 }
 0x16d   :  { %v372_v36 = vrot.slane %v371_v31, 2 }
 0x16e   :  { %1005 = vmatpush3.bf16.msra.mxu0 %v1004_v15  ;;  %v744_v15 = vsel %vm258_vm4, 1.0, %v1208_v28 }
 0x16f   :  { %961 = vmatpush3.bf16.msra.mxu1 %v960_v32  ;;  %v364_v19 = vrot.slane %v744_v15, 4 }
 0x170   :  { %963 = vmatprep.subr.bf16.mxu1 %v962_v33 }
 0x171   :  { %v365_v27 = vadd.f32 %v744_v15, %v364_v19 }
 0x173   :  { %965 = vmatpush3.bf16.msra.mxu1 %v964_v38  ;;  %v366_v34 = vrot.slane %v365_v27, 2 }
 0x174   :  { %967 = vmatprep.subr.bf16.mxu1 %v966_v39  ;;  %v373_v39 = vadd.f32 %v372_v36, %v371_v31 }
 0x175   :  { %v367_v38 = vadd.f32 %v366_v34, %v365_v27 }
 0x176   :  { %v374_v42 = vrot.slane %v373_v39, 1 }
 0x177   :  { %969 = vmatpush3.bf16.msra.mxu1 %v968_v44  ;;  %v368_v40 = vrot.slane %v367_v38, 1 }
 0x178   :  { %971 = vmatprep.subr.bf16.mxu1 %v970_v45 }
 0x179   :  { %v369_v44 = vadd.f32 %v368_v40, %v367_v38 }
 0x17b   :  { %973 = vmatpush3.bf16.msra.mxu1 %v972_v48  ;;  %v375_v48 = vadd.f32 %v374_v42, %v373_v39 }
 0x17c   :  { %1006 = vmatprep.subr.bf16.mxu1 %v1209_v49 }
 0x1f0   :  { %v237_v52 = vpop.xlane.xlu0 %236 }
 0x1f1   :  { %v242_v53 = vadd.f32 %v241_v51, %v237_v52 }
 0x1f3   :  { %v260_v57 = vsel %vm258_vm4, -9e+15, %v242_v53  ;;  %v1385_v53 = vsub.f32 8.0, %v369_v44 }
 0x1f4   :  { %v262_v58 = vrot.slane %v260_v57, 4  ;;  %v239_v59 = vpop.xlane.xlu0 %238 }
 0x1f5   :  { %v243_v60 = vadd.f32 %v241_v51, %v239_v59  ;;  %vm378_vm7 = vcmp.eq.f32.partialorder %v1385_v53, 1.0 }
 0x1f6   :  { %v263_v61 = vmax.f32 %v260_v57, %v262_v58 }
 0x1f7   :  { %v261_v62 = vsel %vm259_vm5, -9e+15, %v243_v60  ;;  %v1392_v60 = vsub.f32 8.0, %v375_v48 }
 0x1f8   :  { %v264_v63 = vrot.slane %v263_v61, 2  ;;  %v268_v0 = vrot.slane %v261_v62, 4 }
 0x1f9   :  { %vm379_vm8 = vcmp.eq.f32.partialorder %v1392_v60, 1.0 }
 0x1fa   :  { %v265_v1 = vmax.f32 %v263_v61, %v264_v63  ;;  %v269_v2 = vmax.f32 %v261_v62, %v268_v0 }
 0x1fc   :  { %v266_v3 = vrot.slane %v265_v1, 1  ;;  %v270_v4 = vrot.slane %v269_v2, 2 }
 0x1fe   :  { %v267_v5 = vmax.f32 %v265_v1, %v266_v3  ;;  %v271_v6 = vmax.f32 %v269_v2, %v270_v4  ;;  %v746_v1 = vadd.f32 -1.0, %v1385_v53 }
 0x200   :  { %v274_v7 = vsub.f32 %v260_v57, %v267_v5  ;;  %v272_v8 = vrot.slane %v271_v6, 1 }
 0x202   :  { %v276_v9 = vmul.f32 1.442695, %v274_v7  ;;  %v273_v10 = vmax.f32 %v271_v6, %v272_v8  ;;  %v747_v6 = vadd.f32 -1.0, %v1392_v60 }
 0x204   :  { %1047 = vpow2.f32 %v276_v9  ;;  %v275_v11 = vsub.f32 %v261_v62, %v273_v10 }
 0x206   :  { %v278_v12 = vmul.f32 1.442695, %v275_v11  ;;  %v382_v11 = vsel %vm378_vm7, 1.0, %v746_v1 }
 0x208   :  { %1049 = vpow2.f32 %v278_v12 }
 0x20e   :  { %v1048_v13 = vpop.eup %1047 }
 0x20f   :  { %v280_v14 = vrot.slane %v1048_v13, 4 }
 0x211   :  { %v281_v16 = vadd.f32 %v1048_v13, %v280_v14 }
 0x212   :  { %v1050_v17 = vpop.eup %1049 }
 0x213   :  { %v282_v20 = vrot.slane %v281_v16, 2  ;;  %v286_v21 = vrot.slane %v1050_v17, 4 }
 0x215   :  { %v283_v23 = vadd.f32 %v282_v20, %v281_v16  ;;  %v287_v24 = vadd.f32 %v1050_v17, %v286_v21  ;;  %v383_v16 = vsel %vm379_vm8, 1.0, %v747_v6 }
 0x217   :  { %v284_v29 = vrot.slane %v283_v23, 1  ;;  %v288_v30 = vrot.slane %v287_v24, 2 }
 0x219   :  { %v285_v32 = vadd.f32 %v284_v29, %v283_v23  ;;  %v289_v33 = vadd.f32 %v288_v30, %v287_v24 }
 0x21b   :  { %v290_v35 = vrot.slane %v289_v33, 1  ;;  %1051 = vrcp.f32 %v285_v32 }
 0x21d   :  { %v291_v37 = vadd.f32 %v290_v35, %v289_v33 }
 0x21f   :  { %1053 = vrcp.f32 %v291_v37 }
 0x220   :  { %1055 = vrcp.f32 %v382_v11 }
 0x221   :  { %1057 = vrcp.f32 %v383_v16  ;;  %v631_v16 = vld [vmem:[#allocation11 + $0x20] sm:$0xff] }
 0x225   :  { %v1052_v41 = vpop.eup %1051 }
 0x226   :  { %v294_v43 = vmul.f32 %v1052_v41, %v1048_v13 }
 0x228   :  { %v297_v45 = vmul.f32 %v294_v43, %v1344_v25  ;;  %395 = vst.msk [vmem:[%s1452_s10] sm:$0xff] %vm394_vm6, %v294_v43  ;;  %v296_v46 = vmul.f32 %v294_v43, %v1347_v26 }
 0x229   :  { %v1054_v47 = vpop.eup %1053 }
 0x22a   :  { %v295_v50 = vmul.f32 %v1054_v47, %v1050_v17  ;;  %v306_v51 = vrot.slane %v297_v45, 4  ;;  %v300_v52 = vrot.slane %v296_v46, 4  ;;  %v1056_v42 = vpop.eup %1055 }
 0x22b   :  { %v1058_v47 = vpop.eup %1057 }
 0x22c   :  { %v299_v56 = vmul.f32 %v295_v50, %v1353_v54  ;;  %v307_v57 = vadd.f32 %v306_v51, %v297_v45  ;;  %396 = vst.msk [vmem:[%s1452_s10 + $0x8] sm:$0xff] %vm394_vm6, %v295_v50  ;;  %v298_v58 = vmul.f32 %v295_v50, %v1357_v55  ;;  %v301_v59 = vadd.f32 %v300_v52, %v296_v46 }
 0x22e   :  { %v308_v61 = vrot.slane %v307_v57, 2  ;;  %v318_v62 = vrot.slane %v299_v56, 4  ;;  %v302_v63 = vrot.slane %v301_v59, 2  ;;  %v312_v0 = vrot.slane %v298_v58, 4 }
 0x230   :  { %v309_v2 = vadd.f32 %v308_v61, %v307_v57  ;;  %v319_v3 = vadd.f32 %v318_v62, %v299_v56  ;;  %v303_v4 = vadd.f32 %v302_v63, %v301_v59  ;;  %v313_v5 = vadd.f32 %v312_v0, %v298_v58 }
 0x231   :  { %v385_v59 = vmul.f32 %v1056_v42, %v1385_v53  ;;  %v630_v53 = vld [vmem:[#allocation11 + $0x18] sm:$0xff]  ;;  %v749_v42 = vld [vmem:[%s1451_s9] ss:$0 sm:$0xff] }
 0x232   :  { %v310_v7 = vrot.slane %v309_v2, 1  ;;  %v320_v8 = vrot.slane %v319_v3, 2  ;;  %v304_v9 = vrot.slane %v303_v4, 1  ;;  %v314_v10 = vrot.slane %v313_v5, 2 }
 0x234   :  { %v311_v12 = vadd.f32 %v310_v7, %v309_v2  ;;  %v321_v13 = vadd.f32 %v320_v8, %v319_v3  ;;  %v305_v14 = vadd.f32 %v304_v9, %v303_v4  ;;  %v315_v15 = vadd.f32 %v314_v10, %v313_v5  ;;  %v627_v3 = vld [vmem:[#allocation11] sm:$0xff]  ;;  %v628_v4 = vld [vmem:[#allocation11 + $0x8] sm:$0xff] }
 0x235   :  { %v388_v5 = vsel %vm378_vm7, 1.0, %v385_v59  ;;  %v1007_v11 = vpack.c.bf16 %v628_v4, %v627_v3 }
 0x236   :  { %v322_v17 = vrot.slane %v321_v13, 1  ;;  %v325_v18 = vsub.f32 %v1344_v25, %v311_v12  ;;  %v316_v19 = vrot.slane %v315_v15, 1  ;;  %v324_v20 = vsub.f32 %v1347_v26, %v305_v14 }
 0x238   :  { %v323_v21 = vadd.f32 %v322_v17, %v321_v13  ;;  %v329_v22 = vmul.f32 %v325_v18, %v325_v18  ;;  %v317_v23 = vadd.f32 %v316_v19, %v315_v15  ;;  %v328_v24 = vmul.f32 %v324_v20, %v324_v20  ;;  %v633_v18 = vld [vmem:[#allocation11 + $0x30] sm:$0xff]  ;;  %v634_v19 = vld [vmem:[#allocation11 + $0x38] sm:$0xff] }
 0x239   :  { %v1016_v20 = vpack.c.bf16 %v634_v19, %v633_v18 }
 0x23a   :  { %v327_v27 = vsub.f32 %v1353_v54, %v323_v21  ;;  %v333_v29 = vmul.f32 %v329_v22, %v294_v43  ;;  %v545_v30 = vsel %vm465_vm9, %v323_v21, %v311_v12  ;;  %v326_v31 = vsub.f32 %v1357_v55, %v317_v23  ;;  %v635_v21 = vld [vmem:[#allocation11 + $0x40] sm:$0xff]  ;;  %v636_v22 = vld [vmem:[#allocation11 + $0x48] sm:$0xff] }
 0x23b   :  { %612 = vmatprep.mubr.f32.mxu0 %v545_v30  ;;  %v544_v25 = vsel %vm465_vm9, %v317_v23, %v305_v14  ;;  %v332_v32 = vmul.f32 %v328_v24, %v294_v43  ;;  %v629_v14 = vld [vmem:[#allocation11 + $0x10] sm:$0xff]  ;;  %v1019_v23 = vpack.c.bf16 %v636_v22, %v635_v21  ;;  %v639_v30 = vld [vmem:[#allocation11 + $0x60] sm:$0xff] }
 0x23c   :  { %v331_v33 = vmul.f32 %v327_v27, %v327_v27  ;;  %v330_v26 = vmul.f32 %v326_v31, %v326_v31  ;;  %613 = vmatmul.mubr.f32.vlgmr.msra.gmra.mrb[4].mxu0 %v544_v25  ;;  %v342_v34 = vrot.slane %v333_v29, 4  ;;  %v1010_v15 = vpack.c.bf16 %v630_v53, %v629_v14  ;;  %v637_v24 = vld [vmem:[#allocation11 + $0x50] sm:$0xff]  ;;  %v638_v27 = vld [vmem:[#allocation11 + $0x58] sm:$0xff]  ;;  %v640_v31 = vld [vmem:[#allocation11 + $0x68] sm:$0xff] }
 0x23d   :  { %v336_v35 = vrot.slane %v332_v32, 4  ;;  %v1025_v25 = vpack.c.bf16 %v640_v31, %v639_v30 }
 0x23e   :  { %v335_v36 = vmul.f32 %v331_v33, %v295_v50  ;;  %v343_v37 = vadd.f32 %v342_v34, %v333_v29  ;;  %v334_v38 = vmul.f32 %v330_v26, %v295_v50  ;;  %v387_v50 = vmul.f32 %v1058_v47, %v1392_v60  ;;  %v632_v60 = vld [vmem:[#allocation11 + $0x28] sm:$0xff]  ;;  %v642_v33 = vld [vmem:[#allocation11 + $0x78] sm:$0xff] }
 0x23f   :  { %v337_v39 = vadd.f32 %v336_v35, %v332_v32  ;;  %v1013_v17 = vpack.c.bf16 %v632_v60, %v631_v16  ;;  %v1022_v29 = vpack.c.bf16 %v638_v27, %v637_v24  ;;  %v641_v32 = vld [vmem:[#allocation11 + $0x70] sm:$0xff] }
 0x240   :  { %v344_v40 = vrot.slane %v343_v37, 2  ;;  %v354_v54 = vrot.slane %v335_v36, 4  ;;  %v348_v41 = vrot.slane %v334_v38, 4  ;;  %v389_v6 = vsel %vm379_vm8, 1.0, %v387_v50 }
 0x241   :  { %v338_v44 = vrot.slane %v337_v39, 2  ;;  %v1028_v26 = vpack.c.bf16 %v642_v33, %v641_v32 }
 0x242   :  { %v345_v45 = vadd.f32 %v344_v40, %v343_v37  ;;  %v355_v55 = vadd.f32 %v354_v54, %v335_v36  ;;  %v349_v46 = vadd.f32 %v348_v41, %v334_v38  ;;  %v748_v40 = vld [vmem:[%s1449_s7] ss:$0 sm:$0xff] }
 0x243   :  { %v339_v48 = vadd.f32 %v338_v44, %v337_v39 }
 0x244   :  { %v346_v43 = vrot.slane %v345_v45, 1  ;;  %v356_v51 = vrot.slane %v355_v55, 2  ;;  %v350_v52 = vrot.slane %v349_v46, 2 }
 0x245   :  { %v340_v56 = vrot.slane %v339_v48, 1 }
 0x246   :  { %v357_v57 = vadd.f32 %v356_v51, %v355_v55  ;;  %v351_v58 = vadd.f32 %v350_v52, %v349_v46  ;;  %v347_v61 = vadd.f32 %v346_v43, %v345_v45 }
 0x247   :  { %v341_v63 = vadd.f32 %v340_v56, %v339_v48 }
 0x248   :  { %v358_v62 = vrot.slane %v357_v57, 1  ;;  %v352_v0 = vrot.slane %v351_v58, 1  ;;  %v391_v7 = vmul.f32 %v388_v5, %v347_v61 }
 0x249   :  { %v390_v9 = vmul.f32 %v388_v5, %v341_v63 }
 0x24a   :  { %v359_v1 = vadd.f32 %v358_v62, %v357_v57  ;;  %v353_v2 = vadd.f32 %v352_v0, %v351_v58 }
 0x24c   :  { %v393_v8 = vmul.f32 %v389_v6, %v359_v1  ;;  %v392_v10 = vmul.f32 %v389_v6, %v353_v2 }
 0x24e   :  { %v467_v12 = vsel %vm465_vm9, %v393_v8, %v391_v7  ;;  %v466_v13 = vsel %vm465_vm9, %v392_v10, %v390_v9 }
 0x24f   :  { %534 = vmatprep.mubr.f32.mxu1 %v467_v12 }
 0x250   :  { %535 = vmatmul.mubr.f32.vlgmr.msra.gmra.mrb[0].mxu1 %v466_v13 }
 0x251   :  { %1008 = vmatpush3.bf16.msra.mxu1 %v1007_v11  ;;  %907 = vmatprep.mubr.msk.f32.mxu1 %vm1210_vm10, %v1208_v28 }
 0x252   :  { %1009 = vmatprep.subr.bf16.mxu1 %v1209_v49 }
 0x255   :  { %1011 = vmatpush3.bf16.msra.mxu1 %v1010_v15 }
 0x256   :  { %1012 = vmatprep.subr.bf16.mxu1 %v1209_v49 }
 0x259   :  { %1014 = vmatpush3.bf16.msra.mxu1 %v1013_v17 }
 0x25a   :  { %1015 = vmatprep.subr.bf16.mxu1 %v1209_v49 }
 0x25d   :  { %1017 = vmatpush3.bf16.msra.mxu1 %v1016_v20 }
 0x25e   :  { %1018 = vmatprep.subr.bf16.mxu1 %v1209_v49 }
 0x261   :  { %1020 = vmatpush3.bf16.msra.mxu1 %v1019_v23 }
 0x262   :  { %1021 = vmatprep.subr.bf16.mxu1 %v1209_v49 }
 0x265   :  { %1023 = vmatpush3.bf16.msra.mxu1 %v1022_v29 }
 0x266   :  { %1024 = vmatprep.subr.bf16.mxu1 %v1209_v49 }
 0x269   :  { %1026 = vmatpush3.bf16.msra.mxu1 %v1025_v25 }
 0x26a   :  { %1027 = vmatprep.subr.bf16.mxu1 %v1209_v49 }
 0x26d   :  { %1029 = vmatpush3.bf16.msra.mxu1 %v1028_v26 }
 0x30f   :  { %v855_v34 = vpop.f32.mrb[4].mxu0 }
 0x310   :  { %v856_v35 = vpop.f32.mrb[5].mxu0 }
 0x311   :  { %v857_v36 = vadd.f32 %v856_v35, %v855_v34 }
 0x323   :  { %v820_v37 = vpop.f32.mrb[0].mxu1 }
 0x324   :  { %v821_v38 = vpop.f32.mrb[1].mxu1 }
 0x325   :  { %v822_v39 = vadd.f32 %v821_v38, %v820_v37 }
 0x327   :  { %v615_v54 = vadd.f32 %v857_v36, %v822_v39 }
 0x329   :  { %v625_v41 = vadd.f32 %v748_v40, %v615_v54 }
 0x32b   :  { %v626_v49 = vmax.f32 %v625_v41, 0.0 }
 0x32d   :  { %908 = vmatmul.mubr.f32.vlgmr.msra.gmra.mrb[2].mxu1 %v626_v49 }
 0x400   :  { %v716_v28 = vpop.f32.mrb[2].mxu1 }
 0x401   :  { %v717_v44 = vadd.f32 %v749_v42, %v716_v28  ;;  %v909_v45 = vpop.f32.mrb[3].mxu1 }
 0x403   :  { %720 = vst [vmem:[#allocation12] sm:$0x3] %v717_v44 }
 0x404   :  { %1180 = shalt.err (!%p1177_p2)
}
 0x405   :  { %s1181_s16 = scalar_lea.hbm %s1453_s11, 32 }
 0x406   :  { %p1182_p3 = scmp.ne.s32.totalorder %s1453_s11, %s1181_s16  ;;  %p1185_p4 = scmp.lt.u32.totalorder %s1181_s16, %s1453_s11 }
 0x408   :  { %p1187_p5 = pnand %p1185_p4, %p1182_p3 }
 0x40a   :  { %1190 = shalt.err (!%p1187_p5)
}
 0x40b   :  { %732 = dma.vmem_to_hbm [thread:$0]  %s730_s0, 32, %s1453_s11, [#allocation5]  }
 0x40c   :  { %1197 = dma.done.wait [#allocation5], 32  }
 0x40d   :  { %1198 = vsyncadd [#allocation5], 4294967264 }
 0x40e   :  { %738 = vsyncpa [#allocation4], 1 }
 0x40f   :  { %739 = vsyncpa [#allocation7], 1 }
 0x410   :  { %740 = vsyncpa [#allocation10], 1 }
 0x411   :  { %741 = vsyncpa [#allocation5], 1 }

</bundles_post_ra>
